<compile_context>
chip_gen: v7x
topology: tpu7x:2x2x1
jax: 0.10.0
libtpu: 0.0.40
codegen_flags: <defaults>
</compile_context>

<pallas_src>
import functools
import math

import jax
import jax.numpy as jnp
from jax import lax
from jax.experimental import pallas as pl
from jax.experimental.pallas import tpu as pltpu

_MIB = 2 ** 20


def _round_up(a, b):
    return (a + b - 1) // b * b


def _cdiv(a, b):
    return (a + b - 1) // b


def _vmem_capacity_bytes():
    try:
        return int(pltpu.get_tpu_info().vmem_capacity_bytes)
    except Exception:
        return 64 * _MIB  # conservative default (v7x per-core VMEM)


_VMEM_CAP = _vmem_capacity_bytes()
# Leave headroom for compiler-internal scratch: ~54 MiB on 64 MiB parts,
# ~108 MiB on 128 MiB parts.
_VMEM_BUDGET = max(min(int(0.85 * _VMEM_CAP), _VMEM_CAP - 8 * _MIB), 16 * _MIB)
# Resolve pipeline_mode support once at import time (no per-call try/except).
_HAS_BUFFERED = hasattr(pl, "Buffered")


def _pad_to(a, target_shape):
    pads = [(0, t - s) for s, t in zip(a.shape, target_shape)]
    if all(p == (0, 0) for p in pads):
        return a
    return jnp.pad(a, pads)


def _projector_kernel(x_ref, w1_ref, b1_ref, w2_ref, b2_ref, o_ref, acc_ref,
                      *, approximate_gelu=False):
    # x_ref:  (TM, IN)      activation tile, native dtype
    # w1_ref: (IN, TK)      first-layer weight chunk (compute dtype, e.g. bf16)
    # b1_ref: (1, TK)       f32
    # w2_ref: (TK, OUTp)    second-layer weight chunk (compute dtype)
    # b2_ref: (1, OUTp)     f32
    # o_ref:  (TM, OUTp)
    # acc_ref:(TM, OUTp)    f32 accumulator across the HID (reduction) axis
    k = pl.program_id(1)

    @pl.when(k == 0)
    def _():
        acc_ref[...] = jnp.zeros_like(acc_ref)

    # Cast the activation tile on the VPU (hidden under MXU work); HBM traffic
    # for x stays at its native width — no wrapper-side low-precision copy.
    x = x_ref[...].astype(w1_ref.dtype)
    h = jnp.dot(x, w1_ref[...], preferred_element_type=jnp.float32)
    h = h + b1_ref[...]
    if approximate_gelu:
        # tanh/exp go to the EUP slot (co-issues with MXU/VPU work).
        h = jax.nn.gelu(h, approximate=True)
    else:
        # PyTorch nn.GELU() default ("none"): 0.5*x*(1+erf(x/sqrt(2))).
        h = 0.5 * h * (1.0 + lax.erf(h * (1.0 / math.sqrt(2.0))))
    # GELU is per-hidden-column, so chunked accumulation over HID is exact.
    acc_ref[...] += jnp.dot(h.astype(w2_ref.dtype), w2_ref[...],
                            preferred_element_type=jnp.float32)

    @pl.when(k == pl.num_programs(1) - 1)
    def _():
        o_ref[...] = (acc_ref[...] + b2_ref[...]).astype(o_ref.dtype)


def make_projector(w1, b1, w2, b2, *, compute_dtype=jnp.bfloat16,
                   out_dtype=None, tile_m=None, approximate_gelu=False):
    """Prepare (cast + pad) parameters once and return a jitted forward fn.

    Weights are stored [in_features, out_features] (transposed w.r.t.
    PyTorch's [out, in]) so the kernel computes x @ W + b directly.
    Set out_dtype=jnp.bfloat16 if the consumer accepts bf16 (halves writeback).
    """
    in_size, hid_size = w1.shape
    assert w2.shape[0] == hid_size
    out_size = w2.shape[1]

    c_bytes = jnp.dtype(compute_dtype).itemsize
    out_p = _round_up(out_size, 128)

    # ---- hidden-dim (reduction) chunk: bound resident weight VMEM ----------
    hid_p0 = _round_up(hid_size, 128)
    resident_w = (in_size + out_p) * hid_p0 * c_bytes   # one copy of both Ws
    w_nbuf_full = 1 if _HAS_BUFFERED else 2             # single-buffer if honored
    if w_nbuf_full * resident_w <= int(0.6 * _VMEM_BUDGET):
        tile_k = hid_p0                                  # weights fully resident
    else:
        # Stream double-buffered weight chunks along the hidden axis; spend
        # ~half the budget on them, keep the rest for activation tiles.
        per_col = 2 * (in_size + out_p) * c_bytes
        tile_k = max(128, (int(0.5 * _VMEM_BUDGET) // per_col) // 128 * 128)
        tile_k = min(tile_k, hid_p0)
    # Pad HID so tile_k divides it exactly: ragged blocks on a reduction axis
    # would feed undefined data into the accumulator. Zero-padded hidden
    # columns give GELU(0)=0 against zero W2 rows, so semantics are unchanged.
    hid_p = _round_up(hid_size, tile_k)
    n_k = hid_p // tile_k
    w_nbuf = 1 if (n_k == 1 and _HAS_BUFFERED) else 2
    weight_bytes = (w_nbuf * (tile_k * (in_size + out_p) * c_bytes + tile_k * 4)
                    + 2 * out_p * 4)

    # ---- cast + pad parameters ONCE (outside the per-call path) ------------
    w1p = _pad_to(jnp.asarray(w1, compute_dtype), (in_size, hid_p))
    w2p = _pad_to(jnp.asarray(w2, compute_dtype), (hid_p, out_p))
    b1p = _pad_to(jnp.asarray(b1, jnp.float32).reshape(1, hid_size), (1, hid_p))
    b2p = _pad_to(jnp.asarray(b2, jnp.float32).reshape(1, out_size), (1, out_p))

    kernel = functools.partial(_projector_kernel,
                               approximate_gelu=approximate_gelu)
    # Grid-invariant weight blocks (n_k == 1): request single buffering to
    # halve resident weight VMEM; otherwise keep default double buffering so
    # weight-chunk DMA pipelines behind the MXU.
    wmode = dict(pipeline_mode=pl.Buffered(1)) if w_nbuf == 1 else {}

    @jax.jit
    def forward(x):
        assert x.shape[-1] == in_size, "last dim of x must equal input_size"
        odt = out_dtype if out_dtype is not None else x.dtype
        x2d = x.reshape(-1, in_size)          # native dtype; kernel casts
        m = x2d.shape[0]

        x_bytes = jnp.dtype(x2d.dtype).itemsize
        o_bytes = jnp.dtype(odt).itemsize
        sublane = 16 if min(x_bytes, o_bytes) == 2 else 8

        # ---- M tile from the remaining VMEM budget ----
        act_budget = max(_VMEM_BUDGET - weight_bytes, 4 * _MIB)
        per_row = (2 * in_size * x_bytes      # double-buffered x tile
                   + 2 * out_p * o_bytes      # double-buffered out tile
                   + 4 * out_p                # f32 accumulator scratch
                   + 12 * tile_k)             # ~3 f32 copies of the h chunk
        tm = tile_m if tile_m is not None else (
            512 if _VMEM_BUDGET >= 96 * _MIB else 256)
        tm = min(tm, max(sublane, (act_budget // per_row) // sublane * sublane))
        tm = max(sublane, min(tm, _round_up(m, sublane)))
        tm = _round_up(tm, sublane)
        # v7x megacore: a 1-step M grid would idle one of the two TensorCores.
        if _cdiv(m, tm) == 1 and m > sublane:
            tm = _round_up(_cdiv(m, 2), sublane)
        n_m = _cdiv(m, tm)

        footprint = (weight_bytes
                     + 2 * tm * in_size * x_bytes
                     + 2 * tm * out_p * o_bytes
                     + tm * out_p * 4
                     + 3 * tm * tile_k * 4)
        # Never request less than the footprint; never more than physical VMEM.
        vmem_limit = min(_VMEM_CAP, max(int(footprint * 1.2), 32 * _MIB))

        in_specs = [
            pl.BlockSpec((tm, in_size), lambda i, k: (i, 0)),
            pl.BlockSpec((in_size, tile_k), lambda i, k: (0, k), **wmode),
            pl.BlockSpec((1, tile_k), lambda i, k: (0, k), **wmode),
            pl.BlockSpec((tile_k, out_p), lambda i, k: (k, 0), **wmode),
            pl.BlockSpec((1, out_p), lambda i, k: (0, 0), **wmode),
        ]
        out2d = pl.pallas_call(
            kernel,
            out_shape=jax.ShapeDtypeStruct((m, out_p), odt),
            grid_spec=pltpu.PrefetchScalarGridSpec(
                num_scalar_prefetch=0,
                grid=(n_m, n_k),              # reduction (HID) axis last
                in_specs=in_specs,
                out_specs=pl.BlockSpec((tm, out_p), lambda i, k: (i, 0)),
                scratch_shapes=[pltpu.VMEM((tm, out_p), jnp.float32)],
            ),
            compiler_params=pltpu.CompilerParams(
                dimension_semantics=("parallel", "arbitrary"),
                vmem_limit_bytes=int(vmem_limit),
            ),
        )(x2d, w1p, b1p, w2p, b2p)

        if out_p != out_size:
            out2d = out2d[:, :out_size]       # fuses with reshape under jit
        return out2d.reshape(*x.shape[:-1], out_size)

    return forward


def init_projector_params(key, input_size, hidden_size, output_size,
                          dtype=jnp.float32):
    """Deterministic init mimicking nn.Linear's Kaiming-uniform defaults."""
    k1, k2, k3, k4 = jax.random.split(key, 4)
    bound1 = 1.0 / math.sqrt(input_size)
    bound2 = 1.0 / math.sqrt(hidden_size)
    # Stored as [in, out] (transposed w.r.t. PyTorch's [out, in]).
    w1 = jax.random.uniform(k1, (input_size, hidden_size), dtype,
                            minval=-bound1, maxval=bound1)
    b1 = jax.random.uniform(k2, (hidden_size,), dtype,
                            minval=-bound1, maxval=bound1)
    w2 = jax.random.uniform(k3, (hidden_size, output_size), dtype,
                            minval=-bound2, maxval=bound2)
    b2 = jax.random.uniform(k4, (output_size,), dtype,
                            minval=-bound2, maxval=bound2)
    return w1, b1, w2, b2


def _reference_forward_f32(x, w1, b1, w2, b2):
    h = x @ w1 + b1
    h = 0.5 * h * (1.0 + lax.erf(h / math.sqrt(2.0)))
    return h @ w2 + b2


def _reference_forward_bf16(x, w1, b1, w2, b2, compute_dtype=jnp.bfloat16):
    f32 = jnp.float32
    xc = x.astype(compute_dtype).astype(f32)
    w1c = w1.astype(compute_dtype).astype(f32)
    w2c = w2.astype(compute_dtype).astype(f32)
    h = xc @ w1c + b1.astype(f32)
    h = 0.5 * h * (1.0 + lax.erf(h / math.sqrt(2.0)))
    y = h.astype(compute_dtype).astype(f32) @ w2c + b2.astype(f32)
    return y.astype(x.dtype)


if __name__ == "__main__":
    key = jax.random.PRNGKey(0)
    kx, kp = jax.random.split(key)

    batch, seq = 2, 8
    input_size, hidden_size, output_size = 32, 64, 32

    x = jax.random.normal(kx, (batch, seq, input_size), dtype=jnp.float32)
    w1, b1, w2, b2 = init_projector_params(
        kp, input_size, hidden_size, output_size)

    projector = make_projector(w1, b1, w2, b2)
    y = jax.block_until_ready(projector(x))

    assert y.shape == (batch, seq, output_size)

    # Tight check against a reference that applies the same bf16 rounding
    # (only f32 accumulation order differs).
    y_ref_bf16 = _reference_forward_bf16(x, w1, b1, w2, b2)
    assert jnp.allclose(y, y_ref_bf16, atol=2e-3, rtol=2e-3), \
        "mismatch vs bf16-matched reference"

    # Loose check against the exact f32 PyTorch-semantics reference.
    y_ref_f32 = _reference_forward_f32(x, w1, b1, w2, b2)
    assert jnp.allclose(y, y_ref_f32, atol=5e-2, rtol=5e-2), \
        "mismatch vs exact f32 reference"

    print("KERNEL_OK")
</pallas_src>

<mosaic_0001>
module attributes {stable_mosaic.version = 11 : i64} {
  func.func @_projector_kernel(%arg0: i32, %arg1: i32, %arg2: memref<8x32xf32, #tpu.memory_space<vmem>>, %arg3: memref<32x128xbf16, #tpu.memory_space<vmem>>, %arg4: memref<1x128xf32, #tpu.memory_space<vmem>>, %arg5: memref<128x128xbf16, #tpu.memory_space<vmem>>, %arg6: memref<1x128xf32, #tpu.memory_space<vmem>>, %arg7: memref<8x128xf32, #tpu.memory_space<vmem>>, %arg8: memref<8x128xf32, #tpu.memory_space<vmem>>) attributes {dimension_semantics = [#tpu.dimension_semantics<parallel>, #tpu.dimension_semantics<arbitrary>], iteration_bounds = array<i64: 2, 1>, scalar_prefetch = 0 : i64, scratch_operands = 1 : i64, tpu.core_type = #tpu.core_type<tc>, window_params = [{transform_indices = @transform_0, window_bounds = array<i64: 8, 32>}, {pipeline_mode = #tpu.pipeline_mode<synchronous>, transform_indices = @transform_1, window_bounds = array<i64: 32, 128>}, {pipeline_mode = #tpu.pipeline_mode<synchronous>, transform_indices = @transform_2, window_bounds = array<i64: 1, 128>}, {pipeline_mode = #tpu.pipeline_mode<synchronous>, transform_indices = @transform_3, window_bounds = array<i64: 128, 128>}, {pipeline_mode = #tpu.pipeline_mode<synchronous>, transform_indices = @transform_4, window_bounds = array<i64: 1, 128>}, {transform_indices = @transform_5, window_bounds = array<i64: 8, 128>}]} {
    %c0_i32 = arith.constant 0 : i32
    %0 = arith.cmpi eq, %arg1, %c0_i32 : i32
    %1 = arith.extui %0 : i1 to i32
    %c0_i32_0 = arith.constant 0 : i32
    %2 = arith.cmpi ne, %1, %c0_i32_0 : i32
    scf.if %2 {
      %cst_18 = arith.constant 0.000000e+00 : f32
      %27 = vector.broadcast %cst_18 : f32 to vector<8x128xf32>
      %c0_19 = arith.constant 0 : index
      %c0_20 = arith.constant 0 : index
      %28 = vector.load %arg8[%c0_19, %c0_20] : memref<8x128xf32, #tpu.memory_space<vmem>>, vector<8x128xf32>
      tpu.vector_store %arg8[%c0_19, %c0_20], %27 {strides = array<i32>} : memref<8x128xf32, #tpu.memory_space<vmem>>, vector<8x128xf32>,
    } else {
    }
    %c0 = arith.constant 0 : index
    %c0_1 = arith.constant 0 : index
    %3 = vector.load %arg2[%c0, %c0_1] : memref<8x32xf32, #tpu.memory_space<vmem>>, vector<8x32xf32>
    %4 = arith.truncf %3 : vector<8x32xf32> to vector<8x32xbf16>
    %c0_2 = arith.constant 0 : index
    %c0_3 = arith.constant 0 : index
    %5 = vector.load %arg3[%c0_2, %c0_3] : memref<32x128xbf16, #tpu.memory_space<vmem>>, vector<32x128xbf16>
    %cst = arith.constant dense<0.000000e+00> : vector<8x128xf32>
    %6 = tpu.matmul %4, %5, %cst {dimension_numbers = #tpu.dot_dimension_numbers<[1], [0], [0], [1], [0, 0, 1, 1], [], []>} : vector<8x32xbf16>, vector<32x128xbf16>, vector<8x128xf32> -> vector<8x128xf32>
    %c0_4 = arith.constant 0 : index
    %c0_5 = arith.constant 0 : index
    %7 = vector.load %arg4[%c0_4, %c0_5] : memref<1x128xf32, #tpu.memory_space<vmem>>, vector<1x128xf32>
    %8 = vector.broadcast %7 : vector<1x128xf32> to vector<8x128xf32>
    %9 = arith.addf %6, %8 : vector<8x128xf32>
    %cst_6 = arith.constant 5.000000e-01 : f32
    %10 = vector.broadcast %cst_6 : f32 to vector<8x128xf32>
    %11 = arith.mulf %10, %9 : vector<8x128xf32>
    %cst_7 = arith.constant 0.707106769 : f32
    %12 = vector.broadcast %cst_7 : f32 to vector<8x128xf32>
    %13 = arith.mulf %9, %12 : vector<8x128xf32>
    %14 = math.erf %13 : vector<8x128xf32>
    %cst_8 = arith.constant 1.000000e+00 : f32
    %15 = vector.broadcast %cst_8 : f32 to vector<8x128xf32>
    %16 = arith.addf %15, %14 : vector<8x128xf32>
    %17 = arith.mulf %11, %16 : vector<8x128xf32>
    %c0_9 = arith.constant 0 : index
    %c0_10 = arith.constant 0 : index
    %18 = vector.load %arg8[%c0_9, %c0_10] : memref<8x128xf32, #tpu.memory_space<vmem>>, vector<8x128xf32>
    %19 = arith.truncf %17 : vector<8x128xf32> to vector<8x128xbf16>
    %c0_11 = arith.constant 0 : index
    %c0_12 = arith.constant 0 : index
    %20 = vector.load %arg5[%c0_11, %c0_12] : memref<128x128xbf16, #tpu.memory_space<vmem>>, vector<128x128xbf16>
    %cst_13 = arith.constant dense<0.000000e+00> : vector<8x128xf32>
    %21 = tpu.matmul %19, %20, %cst_13 {dimension_numbers = #tpu.dot_dimension_numbers<[1], [0], [0], [1], [0, 0, 1, 1], [], []>} : vector<8x128xbf16>, vector<128x128xbf16>, vector<8x128xf32> -> vector<8x128xf32>
    %22 = arith.addf %18, %21 : vector<8x128xf32>
    %c0_14 = arith.constant 0 : index
    %c0_15 = arith.constant 0 : index
    %23 = vector.load %arg8[%c0_14, %c0_15] : memref<8x128xf32, #tpu.memory_space<vmem>>, vector<8x128xf32>
    tpu.vector_store %arg8[%c0_14, %c0_15], %22 {strides = array<i32>} : memref<8x128xf32, #tpu.memory_space<vmem>>, vector<8x128xf32>,
    %c0_i32_16 = arith.constant 0 : i32
    %24 = arith.cmpi eq, %arg1, %c0_i32_16 : i32
    %25 = arith.extui %24 : i1 to i32
    %c0_i32_17 = arith.constant 0 : i32
    %26 = arith.cmpi ne, %25, %c0_i32_17 : i32
    scf.if %26 {
      %c0_18 = arith.constant 0 : index
      %c0_19 = arith.constant 0 : index
      %27 = vector.load %arg8[%c0_18, %c0_19] : memref<8x128xf32, #tpu.memory_space<vmem>>, vector<8x128xf32>
      %c0_20 = arith.constant 0 : index
      %c0_21 = arith.constant 0 : index
      %28 = vector.load %arg6[%c0_20, %c0_21] : memref<1x128xf32, #tpu.memory_space<vmem>>, vector<1x128xf32>
      %29 = vector.broadcast %28 : vector<1x128xf32> to vector<8x128xf32>
      %30 = arith.addf %27, %29 : vector<8x128xf32>
      %c0_22 = arith.constant 0 : index
      %c0_23 = arith.constant 0 : index
      %31 = vector.load %arg7[%c0_22, %c0_23] : memref<8x128xf32, #tpu.memory_space<vmem>>, vector<8x128xf32>
      tpu.vector_store %arg7[%c0_22, %c0_23], %30 {strides = array<i32>} : memref<8x128xf32, #tpu.memory_space<vmem>>, vector<8x128xf32>,
    } else {
    }
    return
  }
  func.func @transform_0(%arg0: i32, %arg1: i32) -> (i32, i32) {
    %c0_i32 = arith.constant 0 : i32
    %c0_i32_0 = arith.constant 0 : i32
    return %arg0, %c0_i32 : i32, i32
  }
  func.func @transform_1(%arg0: i32, %arg1: i32) -> (i32, i32) {
    %c0_i32 = arith.constant 0 : i32
    %c0_i32_0 = arith.constant 0 : i32
    return %c0_i32, %arg1 : i32, i32
  }
  func.func @transform_2(%arg0: i32, %arg1: i32) -> (i32, i32) {
    %c0_i32 = arith.constant 0 : i32
    %c0_i32_0 = arith.constant 0 : i32
    return %c0_i32, %arg1 : i32, i32
  }
  func.func @transform_3(%arg0: i32, %arg1: i32) -> (i32, i32) {
    %c0_i32 = arith.constant 0 : i32
    %c0_i32_0 = arith.constant 0 : i32
    return %arg1, %c0_i32 : i32, i32
  }
  func.func @transform_4(%arg0: i32, %arg1: i32) -> (i32, i32) {
    %c0_i32 = arith.constant 0 : i32
    %c0_i32_0 = arith.constant 0 : i32
    %c0_i32_1 = arith.constant 0 : i32
    return %c0_i32, %c0_i32_0 : i32, i32
  }
  func.func @transform_5(%arg0: i32, %arg1: i32) -> (i32, i32) {
    %c0_i32 = arith.constant 0 : i32
    %c0_i32_0 = arith.constant 0 : i32
    return %arg0, %c0_i32 : i32, i32
  }
}

</mosaic_0001>

<bundles_post_ra>
// kernel: forward.1
= control target key start
LH: loop header
LB: loop body
LE: loop exit
PB: predicated region body
PF: predicated region fallthrough
CT: control target
= control target key end

     0   :  { %10 = vsyncpa [#allocation4], 0  ;;  %s1087_s0 = inlined_call_operand.hbm [shape: f32[16,32], index: 0, kind: input, shape index: {}]   ;;  %s1088_s1 = inlined_call_operand.vmem [shape: bf16[32,128], index: 1, kind: input, shape index: {}]   ;;  %s1089_s2 = inlined_call_operand.vmem [shape: f32[1,128], index: 2, kind: input, shape index: {}]   ;;  %s1090_s3 = inlined_call_operand.hbm [shape: bf16[128,128], index: 3, kind: input, shape index: {}]   ;;  %s1091_s4 = inlined_call_operand.vmem [shape: f32[1,128], index: 4, kind: input, shape index: {}]   ;;  %s1092_s5 = inlined_call_operand.vmem [shape: f32[16,128], index: 5, kind: output, shape index: {}]  }
   0x1   :  { %12 = vsyncpa [#allocation4 + $0x1], 0 }
   0x2   :  { %13 = vsyncpa [#allocation6], 0  ;;  %s920_s18 = smov 0   ;;  %s922_s19 = smov 0  }
   0x3   :  { %s924_s20 = smov 0   ;;  %s926_s21 = smov 0  }
   0x4   :  { %s928_s22 = smov 0   ;;  %s930_s23 = smov 0  }
   0x5 LB: > { %s620_s24 = sadd.s32 4294967295, %s882_s23   ;;  %p51_p0 = scmp.ne.s32.totalorder %s866_s19, %s862_s18  ;;  %s882_s23 = sphi %s930_s23, %s19_s23   ;;  %s878_s22 = sphi %s928_s22, %s1109_s22   ;;  %s874_s21 = sphi %s926_s21, %s1108_s21   ;;  %s870_s20 = sphi %s924_s20, %s1107_s20   ;;  %s866_s19 = sphi %s922_s19, %s1106_s19   ;;  %s862_s18 = sphi %s920_s18, %s1105_s18  }
   0x6   : > { %p950_p1 = scmp.eq.s32.totalorder %s620_s24, 0  ;;  %p622_p2 = scmp.ge.s32.totalorder %s882_s23, 1 }
   0x7   : > { %p187_p3 = scmp.lt.s32.totalorder %s882_s23, 3  ;;  %s884_s28 = smov [#allocation5]  }
   0x8   : > { %s1097_s25 = scalar_select %p950_p1, 1, 0 }
   0x9   : > { %p958_p4 = por %p950_p1, %p51_p0  ;;  %p962_p5 = pnand %p622_p2, %p187_p3 }
   0xa   : > { %s215_s29 = sshll.u32 %s884_s28, 4  ;;  %s31_s6 = sadd.s32 1, %s878_s22  ;;  %s216_s29 = int_to_ptr.vmem [resolvable:$true] %s215_s29 }
   0xb   : > { %s1098_s26 = scalar_select %p958_p4, 1, 0 }
   0xc   : > { %s1099_s27 = scalar_select %p962_p5, 1, 0 }
   0xd   : > { %p694_p6 = pneg %p962_p5  ;;  %s770_s9 = scalar_lea.hbm %s1090_s3, 1024 }
   0xe   : > { %p771_p8 = scmp.ne.s32.totalorder %s1090_s3, %s770_s9  ;;  %p777_p12 = scmp.lt.u32.totalorder %s770_s9, %s1090_s3 }
   0xf   : > { %p970_p7 = pnand %p694_p6, %p950_p1 }
  0x11   : > { %p772_p9 = pneg %p970_p7 }
  0x13   : > { %p773_p10 = pnand %p772_p9, %p771_p8 }
  0x15   : > { %p774_p11 = pneg %p773_p10 }
  0x17   : > { %p779_p13 = pnand %p777_p12, %p774_p11 }
  0x19   : > { %782 = shalt.err (!%p779_p13)
}
  0x1a   : > { %s783_s14 = scalar_lea.vmem %s216_s29, 1024  ;;  %p791_p6 = scmp.lt.s32.totalorder %s216_s29, %s216_s29 }
  0x1b   : > { %p784_p0 = scmp.ne.s32.totalorder %s216_s29, %s783_s14  ;;  %p792_p1 = scmp.lt.s32.totalorder %s783_s14, %s783_s14 }
  0x1d   : > { %p786_p2 = pnand %p784_p0, %p772_p9  ;;  %p793_p4 = por %p792_p1, %p791_p6 }
  0x1f   : > { %p787_p3 = pneg %p786_p2 }
  0x21   : > { %p794_p5 = pnand %p793_p4, %p787_p3 }
  0x23   : > { %797 = shalt.err (!%p794_p5)
}
  0x24   : > { %s885_s15 = smov 64   ;;  %s886_s16 = smov 4  }
  0x25   : > { %697 = dma.hbm_to_vmem [thread:$0]  (!%p970_p7), %s1090_s3, 1024, %s216_s29, [#allocation6], %s885_s15, %s885_s15, %s886_s16  }
  0x26   : > { %p33_p1 = scmp.ge.s32.totalorder %s31_s6, 2  ;;  %s38_s24 = sadd.s32 1, %s870_s20 }
  0x27   : > { %p45_p4 = scmp.ne.s32.totalorder %s870_s20, %s866_s19  ;;  %p46_p5 = scmp.eq.s32.totalorder %s882_s23, 0 }
  0x28   : > { %s1111_s6 = smov (%p33_p1, %s31_s6), 0  ;;  %p703_p9 = scmp.lt.s32.totalorder %s882_s23, 2 }
  0x29   : > { %p47_p8 = por %p46_p5, %p45_p4  ;;  %s35_s28 = ssub.s32 %s878_s22, %s1111_s6 }
  0x2a   : > { %s232_s7 = sand.u32 1, %s870_s20   ;;  %p36_p10 = scmp.eq.s32.totalorder %s35_s28, 0 }
  0x2b   : > { %s627_s8 = sshll.u32 %s232_s7, 3  ;;  %s628_s9 = sshll.u32 %s878_s22, 7 }
  0x2c   : > { %s1003_s10 = scalar_select %p36_p10, %s870_s20, %s38_s24  }
  0x2d   : > { %s1008_s29 = scalar_lea.hbm %s1087_s0, %s628_s9  ;;  %s236_s12 = scalar_lea.vmem [#allocation3], %s627_s8 }
  0x2e   : > { %s243_s13 = sshll.u32 %s236_s12, 4  ;;  %p1010_p7 = pnand %p703_p9, %p47_p8  ;;  %s1014_s13 = int_to_ptr.vmem [resolvable:$true] %s243_s13 }
  0x2f   : > { %s233_s15 = scalar_lea.sflag [#allocation4], %s232_s7  ;;  %s798_s16 = scalar_lea.hbm %s1008_s29, 128 }
  0x30   : > { %p799_p11 = scmp.ne.s32.totalorder %s1008_s29, %s798_s16  ;;  %p800_p12 = pneg %p1010_p7 }
  0x31   : > { %s803_s24 = scalar_lea.hbm %s1087_s0, 256  ;;  %p804_p2 = scmp.lt.u32.totalorder %s1008_s29, %s1087_s0 }
  0x32   : > { %p801_p13 = pnand %p800_p12, %p799_p11  ;;  %p805_p3 = scmp.lt.u32.totalorder %s803_s24, %s798_s16 }
  0x33   : > { %p807_p1 = scmp.lt.u32.totalorder %s798_s16, %s1008_s29 }
  0x34   : > { %p802_p0 = pneg %p801_p13  ;;  %p806_p6 = por %p805_p3, %p804_p2 }
  0x36   : > { %p808_p4 = por %p807_p1, %p806_p6 }
  0x38   : > { %p809_p5 = pnand %p808_p4, %p802_p0 }
  0x3a   : > { %812 = shalt.err (!%p809_p5)
}
  0x3b   : > { %s813_s7 = scalar_lea.vmem %s1014_s13, 128  ;;  %s887_s9 = smov [#allocation3]  }
  0x3c   : > { %p814_p8 = scmp.ne.s32.totalorder %s1014_s13, %s813_s7  ;;  %s818_s30 = sshll.u32 %s887_s9, 4  ;;  %s819_s30 = int_to_ptr.vmem [resolvable:$false] %s818_s30 }
  0x3d   : > { %s820_s11 = scalar_lea.vmem %s819_s30, 256  ;;  %p821_p11 = scmp.lt.s32.totalorder %s1014_s13, %s819_s30 }
  0x3e   : > { %p816_p9 = pnand %p814_p8, %p800_p12  ;;  %p822_p13 = scmp.lt.s32.totalorder %s820_s11, %s813_s7 }
  0x40   : > { %p817_p10 = pneg %p816_p9  ;;  %p823_p2 = por %p822_p13, %p821_p11 }
  0x42   : > { %p824_p3 = pnand %p823_p2, %p817_p10 }
  0x44   : > { %827 = shalt.err (!%p824_p3)
}
  0x45   : > { %701 = dma.hbm_to_vmem [thread:$0]  (!%p1010_p7), %s1008_s29, 128, %s1014_s13, %s233_s15  }
  0x46   : > { %p1102_p0 = scmp.ne.s32.totalorder %s1099_s27, 0 }
  0x47   : > { %s254_s12 = sand.u32 (!%p1102_p0), 1, %s866_s19   ;;  %p1103_p12 = scmp.ne.s32.totalorder (!%p1102_p0), %s1098_s26, 0 }
  0x48   : > { %252 = sbr.rel (%p1102_p0) target bundleno = 541 (0x21d), region = 40  ;;  %s630_s16 = sshll.u32 (!%p1102_p0), %s254_s12, 3 }
  0x49   : > { %s255_s17 = scalar_lea.sflag (!%p1102_p0), [#allocation4], %s254_s12  ;;  %s258_s18 = scalar_lea.vmem (!%p1102_p0), [#allocation3], %s630_s16 }
  0x4f   : > { %853 = dma.done.wait (%p1103_p12), %s255_s17, 128  }
  0x50   : > { %855 = vsyncadd (%p1103_p12), %s255_s17, 4294967168  ;;  %p1104_p6 = scmp.ne.s32.totalorder %s1097_s25, 0 }
  0x52   : > { %857 = dma.done.wait (%p1104_p6), [#allocation6], 1024  }
  0x53   : > { %859 = vsyncadd (%p1104_p6), [#allocation6], 4294966272  ;;  %v888_v0 = vmov 0.0   ;;  %vm889_vm0 = vmmov 0   ;;  %v758_v1 = vld [vmem:[%s1088_s1] sm:$0xff]   ;;  %v759_v2 = vld [vmem:[%s1088_s1 + $0x8] sm:$0xff]  }
  0x54   : > { %660 = vmatprep.subr.bf16.mxu0 %v888_v0  ;;  %664 = vmatprep.mubr.msk.bf16.mxu0 %vm889_vm0, %v888_v0  ;;  %v313_v3 = vld [vmem:[%s258_s18] sm:$0xff]  ;;  %v760_v4 = vld [vmem:[#allocation5] sm:$0xff]   ;;  %vm338_vm1 = vcmask 261120   ;;  %v761_v6 = vld [vmem:[#allocation5 + $0x8] sm:$0xff]   ;;  %p303_p7 = scmp.lt.s32.totalorder %s874_s21, 1 }
  0x55   : > { %668 = vmatprep.subr.bf16.mxu1 %v888_v0  ;;  %684 = vmatprep.mubr.msk.bf16.mxu1 %vm889_vm0, %v888_v0  ;;  %v314_v5 = vpack.c.bf16 %v313_v3, %v313_v3  ;;  %v762_v7 = vld [vmem:[#allocation5 + $0x10] sm:$0xff]   ;;  %v763_v8 = vld [vmem:[#allocation5 + $0x18] sm:$0xff]   ;;  %v764_v9 = vld [vmem:[#allocation5 + $0x20] sm:$0xff]  }
  0x56   : > { %661 = vmatpush3.bf16.msra.mxu0 %v758_v1  ;;  %669 = vmatpush3.bf16.msra.mxu1 %v760_v4  ;;  %v765_v10 = vld [vmem:[#allocation5 + $0x28] sm:$0xff]   ;;  %v766_v11 = vld [vmem:[#allocation5 + $0x30] sm:$0xff]   ;;  %v767_v12 = vld [vmem:[#allocation5 + $0x38] sm:$0xff]   ;;  %s1113_s21 = smov (!%p303_p7, %s874_s21), 1 }
  0x57   : > { %662 = vmatprep.subr.bf16.mxu0 %v888_v0  ;;  %670 = vmatprep.subr.bf16.mxu1 %v888_v0  ;;  %v633_v13 = vld [vmem:[%s1089_s2] ss:$0 sm:$0xff]  ;;  %s632_s15 = sshll.u32 %s1113_s21, 3 }
  0x58   : > { %v645_v25 = vld [vmem:[%s1091_s4] ss:$0 sm:$0xff]  ;;  %s306_s9 = scalar_lea.vmem %s1092_s5, %s632_s15 }
  0x5a   : > { %663 = vmatpush3.bf16.msra.mxu0 %v759_v2  ;;  %671 = vmatpush3.bf16.msra.mxu1 %v761_v6 }
  0x5b   : > { %672 = vmatprep.subr.bf16.mxu1 %v888_v0 }
  0x5d   : > { %665 = vmatmul.mubr.msk.bf16.vlgmr.msra.gmra.mrb[0].mxu0 %vm338_vm1, %v314_v5 }
  0x5e   : > { %673 = vmatpush3.bf16.msra.mxu1 %v762_v7 }
  0x5f   : > { %674 = vmatprep.subr.bf16.mxu1 %v888_v0 }
  0x62   : > { %675 = vmatpush3.bf16.msra.mxu1 %v763_v8 }
  0x63   : > { %676 = vmatprep.subr.bf16.mxu1 %v888_v0 }
  0x66   : > { %677 = vmatpush3.bf16.msra.mxu1 %v764_v9 }
  0x67   : > { %678 = vmatprep.subr.bf16.mxu1 %v888_v0 }
  0x6a   : > { %679 = vmatpush3.bf16.msra.mxu1 %v765_v10 }
  0x6b   : > { %680 = vmatprep.subr.bf16.mxu1 %v888_v0 }
  0x6e   : > { %681 = vmatpush3.bf16.msra.mxu1 %v766_v11 }
  0x6f   : > { %682 = vmatprep.subr.bf16.mxu1 %v888_v0 }
  0x72   : > { %683 = vmatpush3.bf16.msra.mxu1 %v767_v12 }
 0x130   : > { %v376_v14 = vpop.f32.mrb[0].mxu0 }
 0x131   : > { %v377_v15 = vadd.f32 %v633_v13, %v376_v14  ;;  %v666_v16 = vpop.f32.mrb[1].mxu0 }
 0x132   : > { %v379_v17 = vpop.f32.mrb[2].mxu0 }
 0x133   : > { %v383_v18 = vmul.f32 0.70710677, %v377_v15  ;;  %v667_v19 = vpop.f32.mrb[3].mxu0  ;;  %v382_v21 = vmul.f32 0.5, %v377_v15 }
 0x135   : > { %768 = verf.f32 %v383_v18 }
 0x13f   : > { %v769_v20 = vpop.eup %768 }
 0x140   : > { %v385_v22 = vadd.f32 1.0, %v769_v20 }
 0x142   : > { %v386_v23 = vmul.f32 %v385_v22, %v382_v21 }
 0x144   : > { %v388_v24 = vpack.c.bf16 %v386_v23, %v386_v23 }
 0x146   : > { %685 = vmatmul.mubr.bf16.vlgmr.msra.gmra.mrb[0].mxu1 %v388_v24 }
 0x219   : > { %v487_v26 = vpop.f32.mrb[0].mxu1 }
 0x21a   : > { %v506_v27 = vadd.f32 %v645_v25, %v487_v26  ;;  %v686_v28 = vpop.f32.mrb[1].mxu1 }
 0x21b   : > { %v490_v29 = vpop.f32.mrb[2].mxu1 }
 0x21c   : > { %507 = vst [vmem:[%s306_s9] sm:$0xff] %v506_v27  ;;  %v687_v30 = vpop.f32.mrb[3].mxu1 }
 0x21d PF: > { %s19_s23 = sadd.s32 1, %s882_s23   ;;  %s1105_s18 = smov %s866_s19 }
 0x21e   : > { %p16_p1 = scmp.ge.s32.totalorder %s19_s23, 4   ;;  %s1106_s19 = smov %s870_s20 }
 0x21f   : > { %s1107_s20 = smov %s1003_s10  ;;  %s1108_s21 = smov %s878_s22 }
 0x220   : > { %s1109_s22 = smov %s1111_s6  ;;  %18 = sbr.rel (!%p16_p1) target bundleno = 5 (0x5), region = 99 }
 0x227   :  { %527 = vsyncpa [#allocation4], 1 }
 0x228   :  { %529 = vsyncpa [#allocation4 + $0x1], 1 }
 0x229   :  { %530 = vsyncpa [#allocation6], 1 }

</bundles_post_ra>
